<compile_context>
chip_gen: v7x
topology: tpu7x:2x2x1
jax: 0.10.0
libtpu: 0.0.40
codegen_flags: <defaults>
</compile_context>

<pallas_src>
import jax
import jax.numpy as jnp
from jax.experimental import pallas as pl
from jax.experimental.pallas import tpu as pltpu


def _round_up(a: int, b: int) -> int:
    return (a + b - 1) // b * b


def net_kernel(x_ref, w1_ref, b1_ref, w3_ref, b3_ref, o_ref):
    # fc1 on the MXU: (TB, Dp) bf16 @ (Dp, H) bf16 -> f32 accumulate
    h = jnp.dot(x_ref[...], w1_ref[...], preferred_element_type=jnp.float32)
    h = h + b1_ref[...]                      # broadcast (1, H) bias over batch rows
    # dropout (eval / inference mode) == identity
    h = jax.nn.sigmoid(h)                    # f32 elementwise (EUP exp path; v5e-safe)
    # fc3 (H -> 1) as VPU multiply + lane reduction instead of an N=1 MXU dot
    out = jnp.sum(h * w3_ref[...], axis=-1, keepdims=True)   # (TB, 1)
    o_ref[...] = out + b3_ref[0]             # scalar bias from SMEM


def _choose_block_b(B: int, Dp: int, H: int) -> int:
    # Size the batch tile against the scoped-VMEM budget (v7x: 64 MiB phys / 32 MiB default).
    budget = 20 << 20
    resident = Dp * H * 2 * 2 + 2 * H * 4 * 2        # w1 (bf16) + b1/w3 rows (f32), 2 bufs
    per_row = 2 * Dp * 2 + H * 4 + 2 * 4             # x (2 bufs, bf16) + hidden f32 + out
    tb = (budget - resident) // per_row if budget > resident else 16
    tb = int(max(16, min(tb, 1024)))
    tb = (tb // 16) * 16                             # bf16 sublane packing -> multiple of 16
    return max(16, min(tb, _round_up(B, 16)))


def net_forward(x, w1_t, b1, w3_t, b3, *, block_b=None):
    """x: (B, D) f32; w1_t: (D, H); b1: (1, H); w3_t: (H, 1); b3: (1, 1)."""
    B, D = x.shape
    H = w1_t.shape[1]

    # Pad the contraction dim to a lane-aligned multiple of 128 (zero padding is exact).
    Dp = _round_up(D, 128)
    if Dp != D:
        x = jnp.pad(x, ((0, 0), (0, Dp - D)))
        w1_t = jnp.pad(w1_t, ((0, Dp - D), (0, 0)))

    # bf16 operands for the first matmul; accumulation stays f32 on the MXU.
    x_bf = x.astype(jnp.bfloat16)
    w1_bf = w1_t.astype(jnp.bfloat16)

    TB = block_b or _choose_block_b(B, Dp, H)
    Bp = _round_up(B, TB)
    if Bp != B:
        x_bf = jnp.pad(x_bf, ((0, Bp - B), (0, 0)))

    b1_row = b1.reshape(1, H).astype(jnp.float32)
    w3_row = w3_t.reshape(1, H).astype(jnp.float32)
    b3_s = b3.reshape(1).astype(jnp.float32)

    # VMEM limit: resident weights + double-buffered tiles + intermediates + margin.
    vmem_est = (Dp * H * 2 * 2 + 2 * H * 4 * 2
                + 2 * TB * Dp * 2 + 4 * TB * H * 4 + 2 * TB * 4 + (2 << 20))
    vmem_limit = int(min(max(vmem_est, 8 << 20), 48 << 20))

    grid = (Bp // TB,)
    out = pl.pallas_call(
        net_kernel,
        out_shape=jax.ShapeDtypeStruct((Bp, 1), jnp.float32),
        grid=grid,
        in_specs=[
            pl.BlockSpec((TB, Dp), lambda i: (i, 0)),            # x tile (pipelined)
            pl.BlockSpec((Dp, H), lambda i: (0, 0)),             # w1: resident
            pl.BlockSpec((1, H), lambda i: (0, 0)),              # b1: resident
            pl.BlockSpec((1, H), lambda i: (0, 0)),              # w3 row: resident
            pl.BlockSpec(memory_space=pltpu.MemorySpace.SMEM),   # b3 scalar in SMEM
        ],
        out_specs=pl.BlockSpec((TB, 1), lambda i: (i, 0)),
        compiler_params=pltpu.CompilerParams(
            dimension_semantics=("parallel",),       # shards batch tiles across TCs on v7x
            vmem_limit_bytes=vmem_limit,
        ),
    )(x_bf, w1_bf, b1_row, w3_row, b3_s)
    return out[:B]


def init_params(key, input_dim, hidden=512):
    # Deterministic PyTorch-style init: U(-1/sqrt(fan_in), 1/sqrt(fan_in))
    k1, k2, k3, k4 = jax.random.split(key, 4)
    lim1 = 1.0 / (input_dim ** 0.5)
    lim3 = 1.0 / (hidden ** 0.5)
    w1_t = jax.random.uniform(k1, (input_dim, hidden), jnp.float32, -lim1, lim1)
    b1 = jax.random.uniform(k2, (1, hidden), jnp.float32, -lim1, lim1)
    w3_t = jax.random.uniform(k3, (hidden, 1), jnp.float32, -lim3, lim3)
    b3 = jax.random.uniform(k4, (1, 1), jnp.float32, -lim3, lim3)
    return w1_t, b1, w3_t, b3


if __name__ == "__main__":
    key = jax.random.PRNGKey(0)
    kx, kp = jax.random.split(key)

    batch, input_dim = 8, 32
    x = jax.random.normal(kx, (batch, input_dim), jnp.float32)
    w1_t, b1, w3_t, b3 = init_params(kp, input_dim)

    out = net_forward(x, w1_t, b1, w3_t, b3)
    jax.block_until_ready(out)
    assert out.shape == (batch, 1)

    # Reference matching the kernel's numerics (bf16 fc1 inputs, f32 accumulate).
    ref_h = jnp.dot(x.astype(jnp.bfloat16), w1_t.astype(jnp.bfloat16),
                    preferred_element_type=jnp.float32) + b1
    ref = jax.nn.sigmoid(ref_h) @ w3_t + b3
    assert jnp.allclose(out, ref, atol=1e-4, rtol=1e-4)

    # Loose sanity check against the pure-f32 forward.
    ref_f32 = jax.nn.sigmoid(x @ w1_t + b1) @ w3_t + b3
    assert jnp.allclose(out, ref_f32, atol=5e-2, rtol=5e-2)

    print("KERNEL_OK")
</pallas_src>

<mosaic_0001>
module attributes {stable_mosaic.version = 11 : i64} {
  func.func @net_kernel(%arg0: i32, %arg1: memref<16x128xbf16, #tpu.memory_space<vmem>>, %arg2: memref<128x512xbf16, #tpu.memory_space<vmem>>, %arg3: memref<1x512xf32, #tpu.memory_space<vmem>>, %arg4: memref<1x512xf32, #tpu.memory_space<vmem>>, %arg5: memref<1xf32, #tpu.memory_space<smem>>, %arg6: memref<16x1xf32, #tpu.memory_space<vmem>>) attributes {dimension_semantics = [#tpu.dimension_semantics<parallel>], iteration_bounds = array<i64: 1>, scalar_prefetch = 0 : i64, scratch_operands = 0 : i64, tpu.core_type = #tpu.core_type<tc>, window_params = [{transform_indices = @transform_0, window_bounds = array<i64: 16, 128>}, {pipeline_mode = #tpu.pipeline_mode<synchronous>, transform_indices = @transform_1, window_bounds = array<i64: 128, 512>}, {pipeline_mode = #tpu.pipeline_mode<synchronous>, transform_indices = @transform_2, window_bounds = array<i64: 1, 512>}, {pipeline_mode = #tpu.pipeline_mode<synchronous>, transform_indices = @transform_3, window_bounds = array<i64: 1, 512>}, {transform_indices = @transform_4, window_bounds = array<i64: 1>}, {transform_indices = @transform_5, window_bounds = array<i64: 16, 1>}]} {
    %c0 = arith.constant 0 : index
    %c0_0 = arith.constant 0 : index
    %0 = vector.load %arg1[%c0, %c0_0] : memref<16x128xbf16, #tpu.memory_space<vmem>>, vector<16x128xbf16>
    %c0_1 = arith.constant 0 : index
    %c0_2 = arith.constant 0 : index
    %1 = vector.load %arg2[%c0_1, %c0_2] : memref<128x512xbf16, #tpu.memory_space<vmem>>, vector<128x512xbf16>
    %cst = arith.constant dense<0.000000e+00> : vector<16x512xf32>
    %2 = tpu.matmul %0, %1, %cst {dimension_numbers = #tpu.dot_dimension_numbers<[1], [0], [0], [1], [0, 0, 1, 1], [], []>} : vector<16x128xbf16>, vector<128x512xbf16>, vector<16x512xf32> -> vector<16x512xf32>
    %c0_3 = arith.constant 0 : index
    %c0_4 = arith.constant 0 : index
    %3 = vector.load %arg3[%c0_3, %c0_4] : memref<1x512xf32, #tpu.memory_space<vmem>>, vector<1x512xf32>
    %4 = vector.broadcast %3 : vector<1x512xf32> to vector<16x512xf32>
    %5 = arith.addf %2, %4 : vector<16x512xf32>
    %6 = arith.negf %5 : vector<16x512xf32>
    %7 = math.exp %6 : vector<16x512xf32>
    %cst_5 = arith.constant 1.000000e+00 : f32
    %8 = vector.broadcast %cst_5 : f32 to vector<16x512xf32>
    %9 = arith.addf %8, %7 : vector<16x512xf32>
    %10 = arith.divf %8, %9 : vector<16x512xf32>
    %c0_6 = arith.constant 0 : index
    %c0_7 = arith.constant 0 : index
    %11 = vector.load %arg4[%c0_6, %c0_7] : memref<1x512xf32, #tpu.memory_space<vmem>>, vector<1x512xf32>
    %12 = vector.broadcast %11 : vector<1x512xf32> to vector<16x512xf32>
    %13 = arith.mulf %10, %12 : vector<16x512xf32>
    %cst_8 = arith.constant dense<0.000000e+00> : vector<16xf32>
    %14 = vector.multi_reduction <add>, %13, %cst_8 [1] : vector<16x512xf32> to vector<16xf32>
    %15 = vector.shape_cast %14 : vector<16xf32> to vector<16x1xf32>
    %c0_9 = arith.constant 0 : index
    %16 = memref.load %arg5[%c0_9] : memref<1xf32, #tpu.memory_space<smem>>
    %17 = vector.broadcast %16 : f32 to vector<16x1xf32>
    %18 = arith.addf %15, %17 : vector<16x1xf32>
    %c0_10 = arith.constant 0 : index
    %c0_11 = arith.constant 0 : index
    %19 = vector.load %arg6[%c0_10, %c0_11] : memref<16x1xf32, #tpu.memory_space<vmem>>, vector<16x1xf32>
    tpu.vector_store %arg6[%c0_10, %c0_11], %18 {strides = array<i32>} : memref<16x1xf32, #tpu.memory_space<vmem>>, vector<16x1xf32>,
    return
  }
  func.func @transform_0(%arg0: i32) -> (i32, i32) {
    %c0_i32 = arith.constant 0 : i32
    %c0_i32_0 = arith.constant 0 : i32
    return %arg0, %c0_i32 : i32, i32
  }
  func.func @transform_1(%arg0: i32) -> (i32, i32) {
    %c0_i32 = arith.constant 0 : i32
    %c0_i32_0 = arith.constant 0 : i32
    %c0_i32_1 = arith.constant 0 : i32
    return %c0_i32, %c0_i32_0 : i32, i32
  }
  func.func @transform_2(%arg0: i32) -> (i32, i32) {
    %c0_i32 = arith.constant 0 : i32
    %c0_i32_0 = arith.constant 0 : i32
    %c0_i32_1 = arith.constant 0 : i32
    return %c0_i32, %c0_i32_0 : i32, i32
  }
  func.func @transform_3(%arg0: i32) -> (i32, i32) {
    %c0_i32 = arith.constant 0 : i32
    %c0_i32_0 = arith.constant 0 : i32
    %c0_i32_1 = arith.constant 0 : i32
    return %c0_i32, %c0_i32_0 : i32, i32
  }
  func.func @transform_4(%arg0: i32) -> i32 {
    %c0_i32 = arith.constant 0 : i32
    %c0_i32_0 = arith.constant 0 : i32
    return %c0_i32 : i32
  }
  func.func @transform_5(%arg0: i32) -> (i32, i32) {
    %c0_i32 = arith.constant 0 : i32
    %c0_i32_0 = arith.constant 0 : i32
    return %arg0, %c0_i32 : i32, i32
  }
}

</mosaic_0001>

<bundles_post_ra>
// kernel: tpu_custom_call.1
= control target key start
LH: loop header
LB: loop body
LE: loop exit
PB: predicated region body
PF: predicated region fallthrough
CT: control target
= control target key end

     0   :  { %11 = vsyncpa [#allocation4], 0  ;;  %s734_s0 = inlined_call_operand.hbm [shape: bf16[16,128], index: 0, kind: input, shape index: {}]   ;;  %s735_s1 = inlined_call_operand.hbm [shape: bf16[128,512], index: 1, kind: input, shape index: {}]   ;;  %s736_s2 = inlined_call_operand.vmem [shape: f32[1,512], index: 2, kind: input, shape index: {}]   ;;  %s737_s3 = inlined_call_operand.vmem [shape: f32[1,512], index: 3, kind: input, shape index: {}]   ;;  %s738_s4 = inlined_call_operand.<no memory space> [shape: f32[1], index: 4, kind: input, shape index: {}]   ;;  %s739_s5 = inlined_call_operand.vmem [shape: f32[16,1], index: 5, kind: output, shape index: {}]  }
   0x1   :  { %12 = vsyncpa [#allocation6], 0  ;;  %s636_s18 = smov [#allocation3]   ;;  %s588_s22 = scalar_lea.hbm %s734_s0, 128 }
   0x2   :  { %s18_s19 = sshll.u32 %s636_s18, 4  ;;  %p589_p0 = scmp.ne.s32.totalorder %s734_s0, %s588_s22  ;;  %s19_s19 = int_to_ptr.vmem [resolvable:$true] %s18_s19 }
   0x3   :  { %p592_p1 = scmp.lt.u32.totalorder %s588_s22, %s734_s0 }
   0x5   :  { %p594_p2 = pnand %p592_p1, %p589_p0 }
   0x7   :  { %597 = shalt.err (!%p594_p2)
}
   0x8   :  { %s598_s27 = scalar_lea.vmem %s19_s19, 128  ;;  %p603_p4 = scmp.lt.s32.totalorder %s19_s19, %s19_s19 }
   0x9   :  { %p599_p3 = scmp.ne.s32.totalorder %s19_s19, %s598_s27  ;;  %p604_p5 = scmp.lt.s32.totalorder %s598_s27, %s598_s27 }
   0xb   :  { %p605_p6 = por %p604_p5, %p603_p4 }
   0xd   :  { %p606_p7 = pnand %p605_p6, %p599_p3 }
   0xf   :  { %609 = shalt.err (!%p606_p7)
}
  0x10   :  { %s637_s28 = smov 64   ;;  %s638_s29 = smov 4  }
  0x11   :  { %24 = dma.hbm_to_vmem [thread:$0]  %s734_s0, 128, %s19_s19, [#allocation4], %s637_s28, %s637_s28, %s638_s29  }
  0x12   :  { %s639_s7 = smov [#allocation5]   ;;  %s610_s11 = scalar_lea.hbm %s735_s1, 4096 }
  0x13   :  { %s30_s8 = sshll.u32 %s639_s7, 4  ;;  %p611_p8 = scmp.ne.s32.totalorder %s735_s1, %s610_s11  ;;  %s31_s8 = int_to_ptr.vmem [resolvable:$true] %s30_s8 }
  0x14   :  { %p614_p9 = scmp.lt.u32.totalorder %s610_s11, %s735_s1 }
  0x16   :  { %p616_p10 = pnand %p614_p9, %p611_p8 }
  0x18   :  { %619 = shalt.err (!%p616_p10)
}
  0x19   :  { %s620_s16 = scalar_lea.vmem %s31_s8, 4096  ;;  %p625_p12 = scmp.lt.s32.totalorder %s31_s8, %s31_s8 }
  0x1a   :  { %p621_p11 = scmp.ne.s32.totalorder %s31_s8, %s620_s16  ;;  %p626_p13 = scmp.lt.s32.totalorder %s620_s16, %s620_s16 }
  0x1c   :  { %p627_p0 = por %p626_p13, %p625_p12 }
  0x1e   :  { %p628_p1 = pnand %p627_p0, %p621_p11 }
  0x20   :  { %631 = shalt.err (!%p628_p1)
}
  0x21   :  { %s640_s0 = smov 256   ;;  %s641_s17 = smov 16  }
  0x22   :  { %36 = dma.hbm_to_vmem [thread:$0]  %s735_s1, 4096, %s31_s8, [#allocation6], %s640_s0, %s640_s0, %s641_s17  }
  0x23   :  { %632 = dma.done.wait [#allocation4], 128  }
  0x24   :  { %633 = vsyncadd [#allocation4], 4294967168 }
  0x25   :  { %634 = dma.done.wait [#allocation6], 4096  }
  0x26   :  { %635 = vsyncadd [#allocation6], 4294963200  ;;  %v642_v0 = vmov 0   ;;  %v507_v1 = vld [vmem:[#allocation5 + $0x4] ss:$16 sps:$4 sm:$0xff]   ;;  %v555_v33 = vld [vmem:[#allocation3] sm:$0xff]   ;;  %v86_v34 = vlaneseq }
  0x27   :  { %304 = vmatprep.mubr.bf16.mxu0 %v642_v0  ;;  %347 = vmatprep.mubr.bf16.mxu1 %v642_v0  ;;  %v509_v2 = vld [vmem:[#allocation5 + $0xc] ss:$16 sps:$4 sm:$0xff]   ;;  %v511_v3 = vld [vmem:[#allocation5] ss:$16 sps:$4 sm:$0xff]   ;;  %v512_v4 = vld [vmem:[#allocation5 + $0x8] ss:$16 sps:$4 sm:$0xff]  }
  0x28   :  { %272 = vmatprep.subr.bf16.mxu0 %v507_v1  ;;  %315 = vmatprep.subr.bf16.mxu1 %v509_v2  ;;  %v513_v5 = vld [vmem:[#allocation5 + $0x24] ss:$16 sps:$4 sm:$0xff]   ;;  %v515_v6 = vld [vmem:[#allocation5 + $0x2c] ss:$16 sps:$4 sm:$0xff]   ;;  %v517_v7 = vld [vmem:[#allocation5 + $0x20] ss:$16 sps:$4 sm:$0xff]  }
  0x29   :  { %273 = vmatpush1.bf16.msra.mxu0 %v511_v3  ;;  %316 = vmatpush1.bf16.msra.mxu1 %v512_v4  ;;  %v518_v8 = vld [vmem:[#allocation5 + $0x28] ss:$16 sps:$4 sm:$0xff]   ;;  %v519_v9 = vld [vmem:[#allocation5 + $0x44] ss:$16 sps:$4 sm:$0xff]   ;;  %v521_v10 = vld [vmem:[#allocation5 + $0x4c] ss:$16 sps:$4 sm:$0xff]  }
  0x2a   :  { %274 = vmatprep.subr.bf16.mxu0 %v513_v5  ;;  %317 = vmatprep.subr.bf16.mxu1 %v515_v6  ;;  %v523_v11 = vld [vmem:[#allocation5 + $0x40] ss:$16 sps:$4 sm:$0xff]   ;;  %v524_v12 = vld [vmem:[#allocation5 + $0x48] ss:$16 sps:$4 sm:$0xff]   ;;  %v525_v13 = vld [vmem:[#allocation5 + $0x64] ss:$16 sps:$4 sm:$0xff]  }
  0x2b   :  { %v527_v14 = vld [vmem:[#allocation5 + $0x6c] ss:$16 sps:$4 sm:$0xff]   ;;  %v529_v15 = vld [vmem:[#allocation5 + $0x60] ss:$16 sps:$4 sm:$0xff]   ;;  %v530_v16 = vld [vmem:[#allocation5 + $0x68] ss:$16 sps:$4 sm:$0xff]  }
  0x2c   :  { %v531_v17 = vld [vmem:[#allocation5 + $0x84] ss:$16 sps:$4 sm:$0xff]   ;;  %v533_v18 = vld [vmem:[#allocation5 + $0x8c] ss:$16 sps:$4 sm:$0xff]   ;;  %v535_v19 = vld [vmem:[#allocation5 + $0x80] ss:$16 sps:$4 sm:$0xff]  }
  0x2d   :  { %275 = vmatpush1.bf16.msra.mxu0 %v517_v7  ;;  %318 = vmatpush1.bf16.msra.mxu1 %v518_v8  ;;  %v536_v20 = vld [vmem:[#allocation5 + $0x88] ss:$16 sps:$4 sm:$0xff]   ;;  %v537_v21 = vld [vmem:[#allocation5 + $0xa4] ss:$16 sps:$4 sm:$0xff]   ;;  %v539_v22 = vld [vmem:[#allocation5 + $0xac] ss:$16 sps:$4 sm:$0xff]  }
  0x2e   :  { %276 = vmatprep.subr.bf16.mxu0 %v519_v9  ;;  %319 = vmatprep.subr.bf16.mxu1 %v521_v10  ;;  %v541_v23 = vld [vmem:[#allocation5 + $0xa0] ss:$16 sps:$4 sm:$0xff]   ;;  %v542_v24 = vld [vmem:[#allocation5 + $0xa8] ss:$16 sps:$4 sm:$0xff]   ;;  %v543_v25 = vld [vmem:[#allocation5 + $0xc4] ss:$16 sps:$4 sm:$0xff]  }
  0x2f   :  { %v545_v26 = vld [vmem:[#allocation5 + $0xcc] ss:$16 sps:$4 sm:$0xff]   ;;  %v547_v27 = vld [vmem:[#allocation5 + $0xc0] ss:$16 sps:$4 sm:$0xff]   ;;  %v548_v28 = vld [vmem:[#allocation5 + $0xc8] ss:$16 sps:$4 sm:$0xff]  }
  0x30   :  { %v549_v29 = vld [vmem:[#allocation5 + $0xe4] ss:$16 sps:$4 sm:$0xff]   ;;  %v551_v30 = vld [vmem:[#allocation5 + $0xec] ss:$16 sps:$4 sm:$0xff]   ;;  %v553_v31 = vld [vmem:[#allocation5 + $0xe0] ss:$16 sps:$4 sm:$0xff]  }
  0x31   :  { %277 = vmatpush1.bf16.msra.mxu0 %v523_v11  ;;  %320 = vmatpush1.bf16.msra.mxu1 %v524_v12  ;;  %v554_v32 = vld [vmem:[#allocation5 + $0xe8] ss:$16 sps:$4 sm:$0xff]   ;;  %v697_v35 = vshrl.u32 %v86_v34, 7  ;;  %vm450_vm0 = vcmask 7168  }
  0x32   :  { %278 = vmatprep.subr.bf16.mxu0 %v525_v13  ;;  %321 = vmatprep.subr.bf16.mxu1 %v527_v14  ;;  %v84_v38 = vld [vmem:[%s736_s2] sm:$0xf] }
  0x33   :  { %v88_v36 = vsub.s32 0, %v697_v35  ;;  %v96_v37 = vsub.s32 2, %v697_v35  ;;  %v92_v39 = vsub.s32 1, %v697_v35  ;;  %v100_v40 = vsub.s32 3, %v697_v35 }
  0x34   :  { %v447_v35 = vstv %s738_s4 }
  0x35   :  { %279 = vmatpush1.bf16.msra.mxu0 %v529_v15  ;;  %322 = vmatpush1.bf16.msra.mxu1 %v530_v16  ;;  %v89_v41 = vrot.slane %v84_v38, %v88_v36  ;;  %v97_v42 = vrot.slane %v84_v38, %v96_v37  ;;  %v93_v43 = vrot.slane %v84_v38, %v92_v39 }
  0x36   :  { %280 = vmatprep.subr.bf16.mxu0 %v531_v17  ;;  %323 = vmatprep.subr.bf16.mxu1 %v533_v18  ;;  %v101_v44 = vrot.slane %v84_v38, %v100_v40 }
  0x39   :  { %281 = vmatpush1.bf16.msra.mxu0 %v535_v19  ;;  %324 = vmatpush1.bf16.msra.mxu1 %v536_v20  ;;  %v406_v19 = vld [vmem:[%s737_s3] sm:$0xf] }
  0x3a   :  { %282 = vmatprep.subr.bf16.mxu0 %v537_v21  ;;  %325 = vmatprep.subr.bf16.mxu1 %v539_v22  ;;  %v411_v22 = vrot.slane %v406_v19, %v88_v36 }
  0x3d   :  { %283 = vmatpush1.bf16.msra.mxu0 %v541_v23  ;;  %326 = vmatpush1.bf16.msra.mxu1 %v542_v24  ;;  %v415_v23 = vrot.slane %v406_v19, %v92_v39  ;;  %v419_v24 = vrot.slane %v406_v19, %v96_v37 }
  0x3e   :  { %284 = vmatprep.subr.bf16.mxu0 %v543_v25  ;;  %327 = vmatprep.subr.bf16.mxu1 %v545_v26 }
  0x41   :  { %285 = vmatpush1.bf16.msra.mxu0 %v547_v27  ;;  %328 = vmatpush1.bf16.msra.mxu1 %v548_v28 }
  0x42   :  { %286 = vmatprep.subr.bf16.mxu0 %v549_v29  ;;  %329 = vmatprep.subr.bf16.mxu1 %v551_v30  ;;  %v423_v30 = vrot.slane %v406_v19, %v100_v40 }
  0x45   :  { %287 = vmatpush1.bf16.msra.mxu0 %v553_v31  ;;  %330 = vmatpush1.bf16.msra.mxu1 %v554_v32 }
  0x48   :  { %305 = vmatmul.mubr.bf16.vlgmr.msra.gmra.mrb[0].mxu0 %v555_v33  ;;  %348 = vmatmul.mubr.bf16.vlgmr.msra.gmra.mrb[0].mxu1 %v555_v33 }
 0x11b   :  { %v306_v45 = vpop.f32.mrb[0].mxu0  ;;  %v349_v46 = vpop.f32.mrb[0].mxu1 }
 0x11c   :  { %v307_v47 = vadd.f32 %v306_v45, %v89_v41  ;;  %v350_v48 = vadd.f32 %v349_v46, %v97_v42  ;;  %v308_v49 = vpop.f32.mrb[1].mxu0  ;;  %v351_v50 = vpop.f32.mrb[1].mxu1 }
 0x11d   :  { %v309_v51 = vadd.f32 %v308_v49, %v93_v43  ;;  %v352_v52 = vadd.f32 %v351_v50, %v101_v44  ;;  %v310_v53 = vpop.f32.mrb[2].mxu0  ;;  %v353_v54 = vpop.f32.mrb[2].mxu1 }
 0x11e   :  { %v492_v55 = vmul.f32 -1.442695, %v307_v47  ;;  %v494_v56 = vmul.f32 -1.442695, %v350_v48  ;;  %v311_v57 = vadd.f32 %v310_v53, %v89_v41  ;;  %v354_v58 = vadd.f32 %v353_v54, %v97_v42  ;;  %v312_v59 = vpop.f32.mrb[3].mxu0  ;;  %v355_v60 = vpop.f32.mrb[3].mxu1 }
 0x11f   :  { %v493_v61 = vmul.f32 -1.442695, %v309_v51  ;;  %v495_v62 = vmul.f32 -1.442695, %v352_v52  ;;  %v313_v63 = vadd.f32 %v312_v59, %v93_v43  ;;  %v356_v0 = vadd.f32 %v355_v60, %v101_v44 }
 0x120   :  { %556 = vpow2.f32 %v492_v55  ;;  %v496_v1 = vmul.f32 -1.442695, %v311_v57  ;;  %v498_v2 = vmul.f32 -1.442695, %v354_v58 }
 0x121   :  { %558 = vpow2.f32 %v494_v56  ;;  %v497_v3 = vmul.f32 -1.442695, %v313_v63  ;;  %v499_v4 = vmul.f32 -1.442695, %v356_v0 }
 0x122   :  { %560 = vpow2.f32 %v493_v61 }
 0x123   :  { %562 = vpow2.f32 %v495_v62 }
 0x124   :  { %564 = vpow2.f32 %v496_v1 }
 0x125   :  { %566 = vpow2.f32 %v498_v2 }
 0x126   :  { %568 = vpow2.f32 %v497_v3 }
 0x127   :  { %570 = vpow2.f32 %v499_v4 }
 0x12a   :  { %v557_v5 = vpop.eup %556 }
 0x12b   :  { %v559_v6 = vpop.eup %558  ;;  %v382_v7 = vadd.f32 1.0, %v557_v5 }
 0x12c   :  { %v561_v8 = vpop.eup %560  ;;  %v384_v9 = vadd.f32 1.0, %v559_v6 }
 0x12d   :  { %v563_v10 = vpop.eup %562  ;;  %572 = vrcp.f32 %v382_v7  ;;  %v383_v11 = vadd.f32 1.0, %v561_v8 }
 0x12e   :  { %v565_v12 = vpop.eup %564  ;;  %574 = vrcp.f32 %v384_v9  ;;  %v385_v13 = vadd.f32 1.0, %v563_v10 }
 0x12f   :  { %v567_v14 = vpop.eup %566  ;;  %576 = vrcp.f32 %v383_v11  ;;  %v386_v15 = vadd.f32 1.0, %v565_v12 }
 0x130   :  { %v569_v16 = vpop.eup %568  ;;  %578 = vrcp.f32 %v385_v13  ;;  %v388_v17 = vadd.f32 1.0, %v567_v14 }
 0x131   :  { %v571_v18 = vpop.eup %570  ;;  %580 = vrcp.f32 %v386_v15  ;;  %v387_v20 = vadd.f32 1.0, %v569_v16 }
 0x132   :  { %582 = vrcp.f32 %v388_v17  ;;  %v389_v21 = vadd.f32 1.0, %v571_v18 }
 0x133   :  { %584 = vrcp.f32 %v387_v20 }
 0x134   :  { %586 = vrcp.f32 %v389_v21 }
 0x137   :  { %v573_v25 = vpop.eup %572 }
 0x138   :  { %v575_v26 = vpop.eup %574  ;;  %v428_v27 = vmul.f32 %v573_v25, %v411_v22 }
 0x139   :  { %v577_v28 = vpop.eup %576  ;;  %v430_v32 = vmul.f32 %v575_v26, %v419_v24 }
 0x13a   :  { %v579_v29 = vpop.eup %578  ;;  %v429_v31 = vmul.f32 %v577_v28, %v415_v23 }
 0x13b   :  { %v581_v33 = vpop.eup %580  ;;  %v431_v42 = vmul.f32 %v579_v29, %v423_v30 }
 0x13c   :  { %v583_v34 = vpop.eup %582  ;;  %v436_v36 = vadd.f32 %v429_v31, %v428_v27  ;;  %v432_v38 = vmul.f32 %v581_v33, %v411_v22 }
 0x13d   :  { %v585_v41 = vpop.eup %584  ;;  %v434_v45 = vmul.f32 %v583_v34, %v419_v24 }
 0x13e   :  { %v437_v39 = vadd.f32 %v436_v36, %v430_v32  ;;  %v433_v43 = vmul.f32 %v585_v41, %v415_v23  ;;  %v587_v44 = vpop.eup %586 }
 0x13f   :  { %v435_v47 = vmul.f32 %v587_v44, %v423_v30 }
 0x140   :  { %v438_v37 = vadd.f32 %v437_v39, %v431_v42  ;;  %v441_v46 = vadd.f32 %v433_v43, %v432_v38 }
 0x142   :  { %439 = vadd.xlane.f32.xlu0 %v438_v37  ;;  %v442_v48 = vadd.f32 %v441_v46, %v434_v45 }
 0x144   :  { %v443_v49 = vadd.f32 %v442_v48, %v435_v47 }
 0x146   :  { %444 = vadd.xlane.f32.xlu0 %v443_v49 }
 0x1cf   :  { %v440_v40 = vpop.xlane.xlu0 %439 }
 0x1d0   :  { %v448_v50 = vadd.f32 %v447_v35, %v440_v40 }
 0x1d2   :  { %451 = vst.msk [vmem:[%s739_s5] sm:$0xff] %vm450_vm0, %v448_v50 }
 0x1d3   :  { %v445_v51 = vpop.xlane.xlu0 %444 }
 0x1d4   :  { %v449_v52 = vadd.f32 %v447_v35, %v445_v51 }
 0x1d6   :  { %452 = vst.msk [vmem:[%s739_s5 + $0x8] sm:$0xff] %vm450_vm0, %v449_v52 }
 0x1d7   :  { %457 = vsyncpa [#allocation4], 1 }
 0x1d8   :  { %458 = vsyncpa [#allocation6], 1 }

</bundles_post_ra>
